<compile_context>
chip_gen: v5e
topology: v5e:2x2
jax: 0.10.0
libtpu: 0.0.40
codegen_flags: <defaults>
</compile_context>

<pallas_src>
import functools

import jax
import jax.numpy as jnp
from jax.experimental import pallas as pl
from jax.experimental.pallas import tpu as pltpu


def _make_kernel(corr_limit, half):
    def kernel(x_ref, w_ref, b_ref, mean_ref, std_ref, corr_ref, head_ref):
        # Single fused matmul on the MXU: [TN, h_dim] @ [h_dim, 3*half+1].
        y = (
            jnp.dot(x_ref[...], w_ref[...], preferred_element_type=jnp.float32)
            + b_ref[...]
        )

        # Column layout of the fused result:
        #   [0, half)            -> mean        (plain linear)
        #   [half, 2*half)       -> std         (softplus(.) + 0.001)
        #   [2*half]             -> corr        (tanh(.) * corr_limit)
        #   [2*half+1, 3*half+1) -> heading     (plain linear)
        mean_ref[...] = y[:, :half]

        s = y[:, half:2 * half]
        # PyTorch Softplus (beta=1, threshold=20), overflow-safe.
        std_ref[...] = jnp.where(
            s > 20.0, s, jnp.log1p(jnp.exp(jnp.minimum(s, 20.0)))
        ) + 0.001

        corr_ref[...] = jnp.tanh(y[:, 2 * half:2 * half + 1]) * corr_limit

        head_ref[...] = y[:, 2 * half + 1:3 * half + 1]

    return kernel


def init_params(key, h_dim, output_dim):
    """Deterministic init mimicking nn.Linear default: U(-1/sqrt(in), 1/sqrt(in))."""
    half = output_dim // 2
    bound = 1.0 / jnp.sqrt(jnp.float32(h_dim))
    keys = jax.random.split(key, 8)

    def lin(kw, kb, out_f):
        w = jax.random.uniform(kw, (h_dim, out_f), jnp.float32, -bound, bound)
        b = jax.random.uniform(kb, (1, out_f), jnp.float32, -bound, bound)
        return w, b

    w_mean, b_mean = lin(keys[0], keys[1], half)
    w_std, b_std = lin(keys[2], keys[3], half)
    w_corr, b_corr = lin(keys[4], keys[5], 1)
    w_head, b_head = lin(keys[6], keys[7], half)
    return dict(
        w_mean=w_mean, b_mean=b_mean,
        w_std=w_std, b_std=b_std,
        w_corr=w_corr, b_corr=b_corr,
        w_head=w_head, b_head=b_head,
    )


def pack_params(params):
    """Concatenate the 4 heads into one fused weight/bias.

    Do this ONCE when the params are created/updated (not per forward call) so
    the per-call path carries no concat/pad copies.
    """
    w_full = jnp.concatenate(
        [params["w_mean"], params["w_std"], params["w_corr"], params["w_head"]],
        axis=1,
    )
    b_full = jnp.concatenate(
        [params["b_mean"], params["b_std"], params["b_corr"], params["b_head"]],
        axis=1,
    )
    return w_full, b_full


_VMEM_CAP = 48 << 20          # stay well inside v7x's 64 MiB physical VMEM
_STEP_HEADROOM = 2 << 20      # Mosaic internal scratch / semaphores


def _vmem_bytes(tn, h_dim, w_cat):
    lane_w = pl.cdiv(w_cat, 128) * 128   # lane-padded width of the fused result
    return 4 * (
        2 * tn * h_dim          # x, double-buffered
        + 2 * h_dim * lane_w    # fused weights (resident, counted conservatively)
        + 2 * lane_w            # fused bias
        + 2 * tn * w_cat        # the 4 outputs, double-buffered (total width)
        + tn * lane_w           # fused matmul result (vreg spill headroom)
    ) + _STEP_HEADROOM


@functools.partial(jax.jit, static_argnames=("corr_limit", "tn"))
def predictions_heads(x, w_full, b_full, corr_limit=0.99, tn=1024):
    n, h_dim = x.shape
    w_cat = w_full.shape[1]               # 3*half + 1
    half = (w_cat - 1) // 3

    # --- Row tiling: TN multiple of 8, shrink if VMEM budget would be exceeded.
    tn_eff = min(tn, max(8, ((n + 7) // 8) * 8))
    while tn_eff > 8 and _vmem_bytes(tn_eff, h_dim, w_cat) > _VMEM_CAP:
        tn_eff = max(8, (tn_eff // 2 // 8) * 8)
    vmem_limit = int(min(max(_vmem_bytes(tn_eff, h_dim, w_cat), 4 << 20), _VMEM_CAP))

    # Ragged grid: no jnp.pad(x), no output slice. Boundary-block input rows
    # are don't-care (row-independent matmul); boundary writes are masked.
    grid = (pl.cdiv(n, tn_eff),)

    out_shapes = (
        jax.ShapeDtypeStruct((n, half), jnp.float32),   # mean
        jax.ShapeDtypeStruct((n, half), jnp.float32),   # std
        jax.ShapeDtypeStruct((n, 1), jnp.float32),      # corr
        jax.ShapeDtypeStruct((n, half), jnp.float32),   # heading
    )
    out_specs = (
        pl.BlockSpec((tn_eff, half), lambda i: (i, 0)),
        pl.BlockSpec((tn_eff, half), lambda i: (i, 0)),
        pl.BlockSpec((tn_eff, 1), lambda i: (i, 0)),
        pl.BlockSpec((tn_eff, half), lambda i: (i, 0)),
    )

    mean, std, corr, heading = pl.pallas_call(
        _make_kernel(float(corr_limit), int(half)),
        out_shape=out_shapes,
        grid=grid,
        in_specs=[
            pl.BlockSpec((tn_eff, h_dim), lambda i: (i, 0)),   # x row tiles
            pl.BlockSpec((h_dim, w_cat), lambda i: (0, 0)),    # fused W (resident)
            pl.BlockSpec((1, w_cat), lambda i: (0, 0)),        # fused bias (resident)
        ],
        out_specs=out_specs,
        compiler_params=pltpu.CompilerParams(
            dimension_semantics=("parallel",),
            vmem_limit_bytes=vmem_limit,
        ),
    )(x, w_full, b_full)

    return mean, std, corr, heading


def _reference(x, params, corr_limit=0.99):
    mean = x @ params["w_mean"] + params["b_mean"]
    std_raw = x @ params["w_std"] + params["b_std"]
    std = jnp.where(
        std_raw > 20.0, std_raw, jnp.log1p(jnp.exp(jnp.minimum(std_raw, 20.0)))
    ) + 0.001
    corr = jnp.tanh(x @ params["w_corr"] + params["b_corr"]) * corr_limit
    heading = x @ params["w_head"] + params["b_head"]
    return mean, std, corr, heading


if __name__ == "__main__":
    H_DIM, OUTPUT_DIM = 32, 8        # -> half = 4, fused width 13
    key = jax.random.PRNGKey(0)
    k_x, k_p = jax.random.split(key)

    params = init_params(k_p, H_DIM, OUTPUT_DIM)
    w_full, b_full = pack_params(params)     # packed once, reused every call

    # Two small batch sizes: a tile-aligned one and a ragged one (exercises the
    # masked boundary block without any host-side padding / slicing).
    for n_rows in (8, 10):
        x = jax.random.normal(jax.random.fold_in(k_x, n_rows),
                              (n_rows, H_DIM), jnp.float32)
        outs = jax.block_until_ready(predictions_heads(x, w_full, b_full))
        refs = _reference(x, params)
        for o, r in zip(outs, refs):
            assert o.shape == r.shape and o.dtype == r.dtype
            assert jnp.allclose(o, r, atol=1e-5, rtol=1e-5), "mismatch vs reference"

    print("KERNEL_OK")
</pallas_src>

<mosaic_0001>
module attributes {stable_mosaic.version = 11 : i64} {
  func.func @kernel(%arg0: i32, %arg1: memref<8x32xf32, #tpu.memory_space<vmem>>, %arg2: memref<32x13xf32, #tpu.memory_space<vmem>>, %arg3: memref<1x13xf32, #tpu.memory_space<vmem>>, %arg4: memref<8x4xf32, #tpu.memory_space<vmem>>, %arg5: memref<8x4xf32, #tpu.memory_space<vmem>>, %arg6: memref<8x1xf32, #tpu.memory_space<vmem>>, %arg7: memref<8x4xf32, #tpu.memory_space<vmem>>) attributes {dimension_semantics = [#tpu.dimension_semantics<parallel>], iteration_bounds = array<i64: 1>, scalar_prefetch = 0 : i64, scratch_operands = 0 : i64, tpu.core_type = #tpu.core_type<tc>, window_params = [{transform_indices = @transform_0, window_bounds = array<i64: 8, 32>}, {pipeline_mode = #tpu.pipeline_mode<synchronous>, transform_indices = @transform_1, window_bounds = array<i64: 32, 13>}, {pipeline_mode = #tpu.pipeline_mode<synchronous>, transform_indices = @transform_2, window_bounds = array<i64: 1, 13>}, {transform_indices = @transform_3, window_bounds = array<i64: 8, 4>}, {transform_indices = @transform_4, window_bounds = array<i64: 8, 4>}, {transform_indices = @transform_5, window_bounds = array<i64: 8, 1>}, {transform_indices = @transform_6, window_bounds = array<i64: 8, 4>}]} {
    %c0 = arith.constant 0 : index
    %c0_0 = arith.constant 0 : index
    %0 = vector.load %arg1[%c0, %c0_0] : memref<8x32xf32, #tpu.memory_space<vmem>>, vector<8x32xf32>
    %c0_1 = arith.constant 0 : index
    %c0_2 = arith.constant 0 : index
    %1 = vector.load %arg2[%c0_1, %c0_2] : memref<32x13xf32, #tpu.memory_space<vmem>>, vector<32x13xf32>
    %cst = arith.constant dense<0.000000e+00> : vector<8x13xf32>
    %2 = tpu.matmul %0, %1, %cst {dimension_numbers = #tpu.dot_dimension_numbers<[1], [0], [0], [1], [0, 0, 1, 1], [], []>} : vector<8x32xf32>, vector<32x13xf32>, vector<8x13xf32> -> vector<8x13xf32>
    %c0_3 = arith.constant 0 : index
    %c0_4 = arith.constant 0 : index
    %3 = vector.load %arg3[%c0_3, %c0_4] : memref<1x13xf32, #tpu.memory_space<vmem>>, vector<1x13xf32>
    %4 = vector.broadcast %3 : vector<1x13xf32> to vector<8x13xf32>
    %5 = arith.addf %2, %4 : vector<8x13xf32>
    %6 = vector.extract_strided_slice %5 {offsets = [0, 0], sizes = [8, 4], strides = [1, 1]} : vector<8x13xf32> to vector<8x4xf32>
    %c0_5 = arith.constant 0 : index
    %c0_6 = arith.constant 0 : index
    %7 = vector.load %arg4[%c0_5, %c0_6] : memref<8x4xf32, #tpu.memory_space<vmem>>, vector<8x4xf32>
    tpu.vector_store %arg4[%c0_5, %c0_6], %6 {strides = array<i32>} : memref<8x4xf32, #tpu.memory_space<vmem>>, vector<8x4xf32>,
    %8 = vector.extract_strided_slice %5 {offsets = [0, 4], sizes = [8, 4], strides = [1, 1]} : vector<8x13xf32> to vector<8x4xf32>
    %cst_7 = arith.constant 2.000000e+01 : f32
    %9 = vector.broadcast %cst_7 : f32 to vector<8x4xf32>
    %10 = arith.cmpf ogt, %8, %9 : vector<8x4xf32>
    %cst_8 = arith.constant 2.000000e+01 : f32
    %11 = vector.broadcast %cst_8 : f32 to vector<8x4xf32>
    %12 = arith.minimumf %8, %11 : vector<8x4xf32>
    %13 = math.exp %12 : vector<8x4xf32>
    %14 = math.log1p %13 : vector<8x4xf32>
    %15 = arith.select %10, %8, %14 : vector<8x4xi1>, vector<8x4xf32>
    %cst_9 = arith.constant 1.000000e-03 : f32
    %16 = vector.broadcast %cst_9 : f32 to vector<8x4xf32>
    %17 = arith.addf %15, %16 : vector<8x4xf32>
    %c0_10 = arith.constant 0 : index
    %c0_11 = arith.constant 0 : index
    %18 = vector.load %arg5[%c0_10, %c0_11] : memref<8x4xf32, #tpu.memory_space<vmem>>, vector<8x4xf32>
    tpu.vector_store %arg5[%c0_10, %c0_11], %17 {strides = array<i32>} : memref<8x4xf32, #tpu.memory_space<vmem>>, vector<8x4xf32>,
    %19 = vector.extract_strided_slice %5 {offsets = [0, 8], sizes = [8, 1], strides = [1, 1]} : vector<8x13xf32> to vector<8x1xf32>
    %20 = math.tanh %19 : vector<8x1xf32>
    %cst_12 = arith.constant 9.900000e-01 : f32
    %21 = vector.broadcast %cst_12 : f32 to vector<8x1xf32>
    %22 = arith.mulf %20, %21 : vector<8x1xf32>
    %c0_13 = arith.constant 0 : index
    %c0_14 = arith.constant 0 : index
    %23 = vector.load %arg6[%c0_13, %c0_14] : memref<8x1xf32, #tpu.memory_space<vmem>>, vector<8x1xf32>
    tpu.vector_store %arg6[%c0_13, %c0_14], %22 {strides = array<i32>} : memref<8x1xf32, #tpu.memory_space<vmem>>, vector<8x1xf32>,
    %24 = vector.extract_strided_slice %5 {offsets = [0, 9], sizes = [8, 4], strides = [1, 1]} : vector<8x13xf32> to vector<8x4xf32>
    %c0_15 = arith.constant 0 : index
    %c0_16 = arith.constant 0 : index
    %25 = vector.load %arg7[%c0_15, %c0_16] : memref<8x4xf32, #tpu.memory_space<vmem>>, vector<8x4xf32>
    tpu.vector_store %arg7[%c0_15, %c0_16], %24 {strides = array<i32>} : memref<8x4xf32, #tpu.memory_space<vmem>>, vector<8x4xf32>,
    return
  }
  func.func @transform_0(%arg0: i32) -> (i32, i32) {
    %c0_i32 = arith.constant 0 : i32
    %c0_i32_0 = arith.constant 0 : i32
    return %arg0, %c0_i32 : i32, i32
  }
  func.func @transform_1(%arg0: i32) -> (i32, i32) {
    %c0_i32 = arith.constant 0 : i32
    %c0_i32_0 = arith.constant 0 : i32
    %c0_i32_1 = arith.constant 0 : i32
    return %c0_i32, %c0_i32_0 : i32, i32
  }
  func.func @transform_2(%arg0: i32) -> (i32, i32) {
    %c0_i32 = arith.constant 0 : i32
    %c0_i32_0 = arith.constant 0 : i32
    %c0_i32_1 = arith.constant 0 : i32
    return %c0_i32, %c0_i32_0 : i32, i32
  }
  func.func @transform_3(%arg0: i32) -> (i32, i32) {
    %c0_i32 = arith.constant 0 : i32
    %c0_i32_0 = arith.constant 0 : i32
    return %arg0, %c0_i32 : i32, i32
  }
  func.func @transform_4(%arg0: i32) -> (i32, i32) {
    %c0_i32 = arith.constant 0 : i32
    %c0_i32_0 = arith.constant 0 : i32
    return %arg0, %c0_i32 : i32, i32
  }
  func.func @transform_5(%arg0: i32) -> (i32, i32) {
    %c0_i32 = arith.constant 0 : i32
    %c0_i32_0 = arith.constant 0 : i32
    return %arg0, %c0_i32 : i32, i32
  }
  func.func @transform_6(%arg0: i32) -> (i32, i32) {
    %c0_i32 = arith.constant 0 : i32
    %c0_i32_0 = arith.constant 0 : i32
    return %arg0, %c0_i32 : i32, i32
  }
}

</mosaic_0001>

<bundles_post_ra>
// kernel: predictions_heads.1
= control target key start
LH: loop header
LB: loop body
LE: loop exit
PB: predicated region body
PF: predicated region fallthrough
CT: control target
= control target key end

     0   :  { %vm27_vm0 = vcmask 261120   ;;  %vm51_vm1 = vcmask 31744   ;;  %s113_s9 = smov 119   ;;  %vm79_vm4 = vcmask 7168   ;;  %s184_s1 = inlined_call_operand.vmem [shape: f32[32,13], index: 1, kind: input, shape index: {}]   ;;  %s185_s2 = inlined_call_operand.vmem [shape: f32[1,13], index: 2, kind: input, shape index: {}]   ;;  %s186_s0 = inlined_call_operand.vmem [shape: f32[8,32], index: 0, kind: input, shape index: {}]   ;;  %s187_s3 = inlined_call_operand.vmem [shape: f32[8,4], index: 3, kind: output, shape index: {0}]   ;;  %s188_s6 = inlined_call_operand.vmem [shape: f32[8,4], index: 6, kind: output, shape index: {3}]   ;;  %s189_s4 = inlined_call_operand.vmem [shape: f32[8,4], index: 4, kind: output, shape index: {1}]   ;;  %s190_s5 = inlined_call_operand.vmem [shape: f32[8,1], index: 5, kind: output, shape index: {2}]  }
   0x1   :  { %v22_v0 = vld [vmem:[%s184_s1 + $0x18] sm:$0xff]  ;;  %v21_v1 = vld [vmem:[%s184_s1 + $0x10] sm:$0xff]  ;;  %v20_v2 = vld [vmem:[%s184_s1 + $0x8] sm:$0xff] }
   0x2   :  { %43 = vmatpush.msra.mxu0 %v22_v0  ;;  %v19_v3 = vld [vmem:[%s184_s1] sm:$0xff] }
   0x3   :  { %v18_v4 = vld [vmem:[%s186_s0] sm:$0xff]  ;;  %s114_s0 = smov 124  }
   0x4   :  { %44 = vmatpush.msra.mxu0 %v21_v1  ;;  %v106_v5 = vld [vmem:[%s185_s2] ss:$0 sm:$0xff]  ;;  %s115_s2 = smov 120  }
   0x6   :  { %45 = vmatpush.msra.mxu0 %v20_v2 }
   0x8   :  { %46 = vmatpush.msra.mxu0 %v19_v3 }
   0x9   :  { %102 = vmatmul.msk.f32.vlgmr.msra.gmra.mxu0 %vm27_vm0, %v18_v4 }
  0x86   :  { %v48_v6 = vpop.f32.mrf.mxu0 }
  0x87   :  { %v49_v7 = vadd.f32 %v106_v5, %v48_v6 }
  0x89   :  { %v54_v8 = vmin.f32 %v49_v7, 20.0  ;;  %82 = vrot.lane.b32.xlu1 %v49_v7, %s113_s9  ;;  %52 = vst.msk [vmem:[%s187_s3] sm:$0xff] %vm51_vm1, %v49_v7  ;;  %vm53_vm3 = vcmp.gt.f32.partialorder %v49_v7, 20.0 }
  0x8b   :  { %v55_v9 = vmul.f32 1.442695, %v54_v8 }
  0x8d   :  { %107 = vpow2.f32 %v55_v9 }
  0x93   :  { %v108_v10 = vpop.eup %107 }
  0x94   :  { %v57_v11 = vadd.f32 1.0, %v108_v10  ;;  %v60_v12 = vmul.f32 -0.5, %v108_v10  ;;  %v63_v14 = vand.u32 2147483647, %v108_v10 }
  0x96   :  { %109 = vlog2.f32 %v57_v11  ;;  %v61_v13 = vadd.f32 1.0, %v60_v12  ;;  %vm64_vm2 = vcmp.lt.f32.partialorder %v63_v14, 0.0004427343 }
  0x97   :  { %111 = vtanh.f32 %v49_v7 }
  0x98   :  { %v62_v17 = vmul.f32 %v108_v10, %v61_v13 }
  0x9c   :  { %v110_v15 = vpop.eup %109 }
  0x9d   :  { %v59_v16 = vmul.f32 0.6931472, %v110_v15  ;;  %v112_v21 = vpop.eup %111 }
  0x9e   :  { %v74_v22 = vmul.f32 0.99, %v112_v21 }
  0x9f   :  { %v65_v18 = vsel %vm64_vm2, %v62_v17, %v59_v16 }
  0xa0   :  { %v66_v19 = vsel %vm53_vm3, %v49_v7, %v65_v18 }
  0xa1   :  { %v67_v20 = vadd.f32 0.001, %v66_v19 }
  0xa3   :  { %69 = vrot.lane.b32.xlu0 %v67_v20, %s114_s0 }
  0xab   :  { %76 = vrot.lane.b32.xlu0 %v74_v22, %s115_s2 }
  0xfb   :  { %v83_v23 = vpop.permute.xlu1 %82 }
  0xfc   :  { %85 = vst.msk [vmem:[%s188_s6] sm:$0xff] %vm51_vm1, %v83_v23 }
 0x115   :  { %v70_v24 = vpop.permute.xlu0 %69 }
 0x116   :  { %72 = vst.msk [vmem:[%s189_s4] sm:$0xff] %vm51_vm1, %v70_v24 }
 0x11d   :  { %v77_v25 = vpop.permute.xlu0 %76 }
 0x11e   :  { %80 = vst.msk [vmem:[%s190_s5] sm:$0xff] %vm79_vm4, %v77_v25 }

</bundles_post_ra>
